<compile_context>
chip_gen: v7x
topology: tpu7x:2x2x1
jax: 0.10.0
libtpu: 0.0.40
codegen_flags: <defaults>
</compile_context>

<pallas_src>
import functools
import math

import jax
import jax.numpy as jnp
from jax.experimental import pallas as pl
from jax.experimental.pallas import tpu as pltpu


def _round_up(x, m):
    return (x + m - 1) // m * m


def _vmem_capacity_bytes():
    try:
        return int(pltpu.get_tpu_info().vmem_capacity_bytes)
    except Exception:
        return 64 << 20  # conservative fallback (v7x per-TC VMEM)


# -----------------------------------------------------------------------------
# Kernel
# -----------------------------------------------------------------------------
def vae_forward_kernel(
    x_ref,      # (TB, Dp)     bf16 flattened input tile
    eps_ref,    # (TB, Lp)     f32  N(0,1) noise tile
    w1_ref,     # (Dp, Hp)     bf16 encoder hidden weight      (grid-invariant)
    b1_ref,     # (1, Hp)      f32
    wmv_ref,    # (Hp, 2*Lp)   bf16 fused [z_mean | z_log_var] head
    bmv_ref,    # (1, 2*Lp)    f32
    wf_ref,     # (Hp, Hp)     bf16 fused wm @ d1 (decoder hidden from h)
    bf_ref,     # (1, Hp)      f32  fused bm @ d1 + db1
    d2_ref,     # (Hp, Dp)     bf16 decoder output weight
    db2_ref,    # (1, Dp)      f32
    xdec_ref,   # out (TB, Dp)     out_dtype
    lat_ref,    # out (TB, 3*Lp)   f32 packed [z_mean | z_log_var | z]
    *,
    lp,         # padded latent dim (multiple of 128) -> all slices lane-aligned
):
    x = x_ref[...]

    # ---- encoder hidden: relu(x @ W1 + b1), f32 accumulation on the MXU ----
    h = jnp.dot(x, w1_ref[...], preferred_element_type=jnp.float32) + b1_ref[...]
    h = jnp.maximum(h, 0.0)
    h_bf = h.astype(jnp.bfloat16)

    # ---- fused [z_mean | z_log_var] head: one MXU pass over (Hp, 2*Lp) ----
    zmv = (jnp.dot(h_bf, wmv_ref[...], preferred_element_type=jnp.float32)
           + bmv_ref[...])
    z_mean = zmv[:, :lp]          # 128-aligned static slices
    z_log_var = zmv[:, lp:]

    # ---- Sampling: z = z_mean + exp(0.5 * z_log_var) * epsilon (f32/EUP) ----
    z = z_mean + jnp.exp(0.5 * z_log_var) * eps_ref[...]

    # ---- decoder (fed z_mean, matching reference forward()); wm@d1 folded ----
    hd = (jnp.dot(h_bf, wf_ref[...], preferred_element_type=jnp.float32)
          + bf_ref[...])
    hd = jnp.maximum(hd, 0.0)
    x_dec = (jnp.dot(hd.astype(jnp.bfloat16), d2_ref[...],
                     preferred_element_type=jnp.float32) + db2_ref[...])

    xdec_ref[...] = x_dec.astype(xdec_ref.dtype)
    # three static, 128-aligned slab stores (lane-dense, no concatenate)
    lat_ref[:, 0:lp] = z_mean
    lat_ref[:, lp:2 * lp] = z_log_var
    lat_ref[:, 2 * lp:3 * lp] = z


# -----------------------------------------------------------------------------
# One-time weight preparation (hoisted out of the forward path)
# -----------------------------------------------------------------------------
def prepare_params(params):
    """Pad to 128-lane multiples, fuse heads, cast MXU operands to bf16.

    Call ONCE per model and reuse the result for every forward step; re-running
    this per call would add O(weight-bytes) HBM traffic per step.
    """
    w1, b1, wm, bm, wv, bv, d1, db1, d2, db2 = params
    D, H = w1.shape
    L = wm.shape[1]
    Dp, Hp, Lp = _round_up(D, 128), _round_up(H, 128), _round_up(L, 128)

    def pad2(a, rows, cols):
        return jnp.pad(a, ((0, rows - a.shape[0]), (0, cols - a.shape[1])))

    # fold decoder hidden into the z_mean head: relu((h@wm+bm)@d1+db1)
    #   = relu(h @ (wm@d1) + (bm@d1 + db1)).  Product in f32, single bf16 cast.
    wf = jnp.dot(wm, d1, preferred_element_type=jnp.float32)            # (H, H)
    bf_ = jnp.dot(bm, d1, preferred_element_type=jnp.float32) + db1     # (1, H)

    # fused, lane-padded [z_mean | z_log_var] head (split point = Lp, aligned)
    wmv = jnp.concatenate([pad2(wm, H, Lp), pad2(wv, H, Lp)], axis=1)   # (H, 2Lp)
    bmv = jnp.concatenate([pad2(bm, 1, Lp), pad2(bv, 1, Lp)], axis=1)   # (1, 2Lp)

    return dict(
        w1=pad2(w1, Dp, Hp).astype(jnp.bfloat16),
        b1=pad2(b1, 1, Hp).astype(jnp.float32),
        wmv=pad2(wmv, Hp, 2 * Lp).astype(jnp.bfloat16),
        bmv=bmv.astype(jnp.float32),
        wf=pad2(wf, Hp, Hp).astype(jnp.bfloat16),
        bf=pad2(bf_, 1, Hp).astype(jnp.float32),
        d2=pad2(d2, Hp, Dp).astype(jnp.bfloat16),
        db2=pad2(db2, 1, Dp).astype(jnp.float32),
    )


# -----------------------------------------------------------------------------
# Forward wrapper
# -----------------------------------------------------------------------------
def vae_forward(x, eps, prep, *, batch_tile=None, out_dtype=jnp.float32):
    """x: (B, seq_len, feat_dim) f32, eps: (B, latent_dim) f32, prep: prepare_params()."""
    B, S, F = x.shape
    L = eps.shape[1]
    D = S * F
    Dp, Hp = prep["w1"].shape
    Lp = prep["wmv"].shape[1] // 2
    assert Dp == _round_up(D, 128) and Lp == _round_up(L, 128)

    # --- generation-aware VMEM budget ---
    vmem_cap = _vmem_capacity_bytes()
    # leave headroom for compiler-internal scratch / semaphores; never above 112 MiB
    vmem_ceiling = min(vmem_cap - (12 << 20), 112 << 20)

    if batch_tile is None:
        # 128 MiB parts (v5e/v6e) take bigger tiles; 64 MiB v7x stays smaller
        batch_tile = 512 if vmem_cap >= (96 << 20) else 256

    Bp8 = _round_up(B, 8)
    TB = min(_round_up(batch_tile, 8), Bp8)
    # guarantee >= 2 grid steps so the "parallel" axis can shard over both v7x TCs
    if Bp8 >= 16:
        TB = min(TB, max(8, (Bp8 // 2) // 8 * 8))

    out_isz = jnp.dtype(out_dtype).itemsize
    weight_bytes = sum(int(a.size) * a.dtype.itemsize for a in prep.values())

    def tile_bytes(tb):
        return tb * (Dp * 2 + Lp * 4 + Dp * out_isz + 3 * Lp * 4)

    headroom = 4 << 20
    # weights single-buffered (Buffered(1)); activation tiles double-buffered.
    # Shrink TB rather than clamping the limit below the real footprint.
    while TB > 8 and weight_bytes + 2 * tile_bytes(TB) + headroom > vmem_ceiling:
        TB = max(8, (TB // 2) // 8 * 8)

    Bp = _round_up(B, TB)
    nb = Bp // TB

    # NOTE: input (and weights) are cast to bf16 for the MXU; f32 accumulation.
    # Intentional deviation from the f32 PyTorch math (see reference_forward).
    x_flat = jnp.pad(x.reshape(B, D).astype(jnp.bfloat16),
                     ((0, Bp - B), (0, Dp - D)))
    eps_p = jnp.pad(eps.astype(jnp.float32), ((0, Bp - B), (0, Lp - L)))

    def tiled(shape):
        return pl.BlockSpec(shape, lambda i: (i, 0))

    def resident(shape):
        # grid-invariant: constant index_map + single buffer (no 2x VMEM cost)
        return pl.BlockSpec(shape, lambda i: (0, 0),
                            pipeline_mode=pl.Buffered(1))

    in_arrays = (x_flat, eps_p, prep["w1"], prep["b1"], prep["wmv"], prep["bmv"],
                 prep["wf"], prep["bf"], prep["d2"], prep["db2"])
    in_specs = [
        tiled((TB, Dp)),            # x tile
        tiled((TB, Lp)),            # eps tile
        resident((Dp, Hp)),         # w1
        resident((1, Hp)),          # b1
        resident((Hp, 2 * Lp)),     # wmv
        resident((1, 2 * Lp)),      # bmv
        resident((Hp, Hp)),         # wf  (wm @ d1)
        resident((1, Hp)),          # bf  (bm @ d1 + db1)
        resident((Hp, Dp)),         # d2
        resident((1, Dp)),          # db2
    ]
    out_shapes = (
        jax.ShapeDtypeStruct((Bp, Dp), out_dtype),        # x_decoded (flat, padded)
        jax.ShapeDtypeStruct((Bp, 3 * Lp), jnp.float32),  # [z_mean | z_log_var | z]
    )
    out_specs = (tiled((TB, Dp)), tiled((TB, 3 * Lp)))

    # advisory cost estimate (fused H x H decoder pass)
    flops = 2 * Bp * (Dp * Hp + Hp * 2 * Lp + Hp * Hp + Hp * Dp)
    bytes_accessed = (
        sum(int(a.size) * a.dtype.itemsize for a in in_arrays)
        + sum(math.prod(s.shape) * jnp.dtype(s.dtype).itemsize for s in out_shapes)
    )
    cost = pl.CostEstimate(flops=flops, transcendentals=Bp * Lp,
                           bytes_accessed=bytes_accessed)

    vmem_needed = weight_bytes + 2 * tile_bytes(TB) + headroom
    vmem_limit = int(min(max(vmem_needed, 16 << 20), vmem_ceiling))

    x_dec_flat, lat = pl.pallas_call(
        functools.partial(vae_forward_kernel, lp=Lp),
        out_shape=out_shapes,
        grid=(nb,),
        in_specs=in_specs,
        out_specs=out_specs,
        compiler_params=pltpu.CompilerParams(
            dimension_semantics=("parallel",),
            vmem_limit_bytes=vmem_limit,
        ),
        cost_estimate=cost,
    )(*in_arrays)

    x_dec = x_dec_flat[:B, :D].reshape(B, S, F)
    z_mean = lat[:B, :L]
    z_log_var = lat[:B, Lp:Lp + L]
    z = lat[:B, 2 * Lp:2 * Lp + L]
    return x_dec, z_mean, z_log_var, z


# -----------------------------------------------------------------------------
# Params / reference / test
# -----------------------------------------------------------------------------
def init_params(key, seq_len, feat_dim, latent_dim, hidden_dim):
    D = seq_len * feat_dim
    ks = jax.random.split(key, 6)
    scale = 0.05
    w1 = scale * jax.random.normal(ks[0], (D, hidden_dim), jnp.float32)
    b1 = jnp.zeros((1, hidden_dim), jnp.float32)
    wm = scale * jax.random.normal(ks[1], (hidden_dim, latent_dim), jnp.float32)
    bm = jnp.zeros((1, latent_dim), jnp.float32)
    wv = scale * jax.random.normal(ks[2], (hidden_dim, latent_dim), jnp.float32)
    bv = jnp.zeros((1, latent_dim), jnp.float32)
    d1 = scale * jax.random.normal(ks[3], (latent_dim, hidden_dim), jnp.float32)
    db1 = jnp.zeros((1, hidden_dim), jnp.float32)
    d2 = scale * jax.random.normal(ks[4], (hidden_dim, D), jnp.float32)
    db2 = jnp.zeros((1, D), jnp.float32)
    return (w1, b1, wm, bm, wv, bv, d1, db1, d2, db2)


def reference_forward(x, eps, params):
    """Pure-JAX reference (two-stage decoder), matched to bf16-MXU / f32-accum."""
    B, S, F = x.shape
    w1, b1, wm, bm, wv, bv, d1, db1, d2, db2 = params
    bf = lambda a: a.astype(jnp.bfloat16)                               # noqa: E731
    dot = lambda a, b: jnp.dot(bf(a), bf(b),                            # noqa: E731
                               preferred_element_type=jnp.float32)
    xf = x.reshape(B, S * F)
    h = jnp.maximum(dot(xf, w1) + b1, 0.0)
    z_mean = dot(h, wm) + bm
    z_log_var = dot(h, wv) + bv
    z = z_mean + jnp.exp(0.5 * z_log_var) * eps
    hd = jnp.maximum(dot(z_mean, d1) + db1, 0.0)
    x_dec = dot(hd, d2) + db2
    return x_dec.reshape(B, S, F), z_mean, z_log_var, z


def _check(got, want, atol=5e-3):
    # tolerance loosened slightly: kernel uses the f32 (wm@d1) fusion, the
    # reference uses the two-stage bf16 path.
    for g, w in zip(got, want):
        assert g.shape == w.shape and g.dtype == w.dtype
        assert jnp.max(jnp.abs(g - w)) < atol, float(jnp.max(jnp.abs(g - w)))


if __name__ == "__main__":
    # small shapes consistent with the module's (seq_len, feat_dim, latent_dim)
    batch, seq_len, feat_dim, latent_dim, hidden_dim = 2, 8, 4, 8, 32

    key = jax.random.PRNGKey(0)
    k_x, k_eps, k_p, k_x2, k_eps2 = jax.random.split(key, 5)

    params = init_params(k_p, seq_len, feat_dim, latent_dim, hidden_dim)
    prep = prepare_params(params)   # one-time weight prep, reused across calls

    # run 1: tiny batch (single grid step, padded to one sublane group)
    x = jax.random.normal(k_x, (batch, seq_len, feat_dim), jnp.float32)
    eps = jax.random.normal(k_eps, (batch, latent_dim), jnp.float32)
    fwd = jax.jit(vae_forward)
    out = jax.block_until_ready(fwd(x, eps, prep))
    _check(out, reference_forward(x, eps, params))

    # run 2: multiple grid steps + batch padding (B=18, TB=8 -> 3 steps)
    B2 = 18
    x2 = jax.random.normal(k_x2, (B2, seq_len, feat_dim), jnp.float32)
    eps2 = jax.random.normal(k_eps2, (B2, latent_dim), jnp.float32)
    fwd2 = jax.jit(functools.partial(vae_forward, batch_tile=8))
    out2 = jax.block_until_ready(fwd2(x2, eps2, prep))
    _check(out2, reference_forward(x2, eps2, params))

    print("KERNEL_OK")
</pallas_src>

<mosaic_0001>
module attributes {stable_mosaic.version = 11 : i64} {
  func.func @vae_forward_kernel(%arg0: i32, %arg1: memref<8x128xbf16, #tpu.memory_space<vmem>>, %arg2: memref<8x128xf32, #tpu.memory_space<vmem>>, %arg3: memref<128x128xbf16, #tpu.memory_space<vmem>>, %arg4: memref<1x128xf32, #tpu.memory_space<vmem>>, %arg5: memref<128x256xbf16, #tpu.memory_space<vmem>>, %arg6: memref<1x256xf32, #tpu.memory_space<vmem>>, %arg7: memref<128x128xbf16, #tpu.memory_space<vmem>>, %arg8: memref<1x128xf32, #tpu.memory_space<vmem>>, %arg9: memref<128x128xbf16, #tpu.memory_space<vmem>>, %arg10: memref<1x128xf32, #tpu.memory_space<vmem>>, %arg11: memref<8x128xf32, #tpu.memory_space<vmem>>, %arg12: memref<8x384xf32, #tpu.memory_space<vmem>>) attributes {dimension_semantics = [#tpu.dimension_semantics<parallel>], iteration_bounds = array<i64: 1>, scalar_prefetch = 0 : i64, scratch_operands = 0 : i64, tpu.core_type = #tpu.core_type<tc>, window_params = [{transform_indices = @transform_0, window_bounds = array<i64: 8, 128>}, {transform_indices = @transform_1, window_bounds = array<i64: 8, 128>}, {pipeline_mode = #tpu.pipeline_mode<synchronous>, transform_indices = @transform_2, window_bounds = array<i64: 128, 128>}, {pipeline_mode = #tpu.pipeline_mode<synchronous>, transform_indices = @transform_3, window_bounds = array<i64: 1, 128>}, {pipeline_mode = #tpu.pipeline_mode<synchronous>, transform_indices = @transform_4, window_bounds = array<i64: 128, 256>}, {pipeline_mode = #tpu.pipeline_mode<synchronous>, transform_indices = @transform_5, window_bounds = array<i64: 1, 256>}, {pipeline_mode = #tpu.pipeline_mode<synchronous>, transform_indices = @transform_6, window_bounds = array<i64: 128, 128>}, {pipeline_mode = #tpu.pipeline_mode<synchronous>, transform_indices = @transform_7, window_bounds = array<i64: 1, 128>}, {pipeline_mode = #tpu.pipeline_mode<synchronous>, transform_indices = @transform_8, window_bounds = array<i64: 128, 128>}, {pipeline_mode = #tpu.pipeline_mode<synchronous>, transform_indices = @transform_9, window_bounds = array<i64: 1, 128>}, {transform_indices = @transform_10, window_bounds = array<i64: 8, 128>}, {transform_indices = @transform_11, window_bounds = array<i64: 8, 384>}]} {
    %c0 = arith.constant 0 : index
    %c0_0 = arith.constant 0 : index
    %0 = vector.load %arg1[%c0, %c0_0] : memref<8x128xbf16, #tpu.memory_space<vmem>>, vector<8x128xbf16>
    %c0_1 = arith.constant 0 : index
    %c0_2 = arith.constant 0 : index
    %1 = vector.load %arg3[%c0_1, %c0_2] : memref<128x128xbf16, #tpu.memory_space<vmem>>, vector<128x128xbf16>
    %cst = arith.constant dense<0.000000e+00> : vector<8x128xf32>
    %2 = tpu.matmul %0, %1, %cst {dimension_numbers = #tpu.dot_dimension_numbers<[1], [0], [0], [1], [0, 0, 1, 1], [], []>} : vector<8x128xbf16>, vector<128x128xbf16>, vector<8x128xf32> -> vector<8x128xf32>
    %c0_3 = arith.constant 0 : index
    %c0_4 = arith.constant 0 : index
    %3 = vector.load %arg4[%c0_3, %c0_4] : memref<1x128xf32, #tpu.memory_space<vmem>>, vector<1x128xf32>
    %4 = vector.broadcast %3 : vector<1x128xf32> to vector<8x128xf32>
    %5 = arith.addf %2, %4 : vector<8x128xf32>
    %cst_5 = arith.constant 0.000000e+00 : f32
    %6 = vector.broadcast %cst_5 : f32 to vector<8x128xf32>
    %7 = arith.maximumf %5, %6 : vector<8x128xf32>
    %8 = arith.truncf %7 : vector<8x128xf32> to vector<8x128xbf16>
    %c0_6 = arith.constant 0 : index
    %c0_7 = arith.constant 0 : index
    %9 = vector.load %arg5[%c0_6, %c0_7] : memref<128x256xbf16, #tpu.memory_space<vmem>>, vector<128x256xbf16>
    %cst_8 = arith.constant dense<0.000000e+00> : vector<8x256xf32>
    %10 = tpu.matmul %8, %9, %cst_8 {dimension_numbers = #tpu.dot_dimension_numbers<[1], [0], [0], [1], [0, 0, 1, 1], [], []>} : vector<8x128xbf16>, vector<128x256xbf16>, vector<8x256xf32> -> vector<8x256xf32>
    %c0_9 = arith.constant 0 : index
    %c0_10 = arith.constant 0 : index
    %11 = vector.load %arg6[%c0_9, %c0_10] : memref<1x256xf32, #tpu.memory_space<vmem>>, vector<1x256xf32>
    %12 = vector.broadcast %11 : vector<1x256xf32> to vector<8x256xf32>
    %13 = arith.addf %10, %12 : vector<8x256xf32>
    %14 = vector.extract_strided_slice %13 {offsets = [0, 0], sizes = [8, 128], strides = [1, 1]} : vector<8x256xf32> to vector<8x128xf32>
    %15 = vector.extract_strided_slice %13 {offsets = [0, 128], sizes = [8, 128], strides = [1, 1]} : vector<8x256xf32> to vector<8x128xf32>
    %cst_11 = arith.constant 5.000000e-01 : f32
    %16 = vector.broadcast %cst_11 : f32 to vector<8x128xf32>
    %17 = arith.mulf %16, %15 : vector<8x128xf32>
    %18 = math.exp %17 : vector<8x128xf32>
    %c0_12 = arith.constant 0 : index
    %c0_13 = arith.constant 0 : index
    %19 = vector.load %arg2[%c0_12, %c0_13] : memref<8x128xf32, #tpu.memory_space<vmem>>, vector<8x128xf32>
    %20 = arith.mulf %18, %19 : vector<8x128xf32>
    %21 = arith.addf %14, %20 : vector<8x128xf32>
    %c0_14 = arith.constant 0 : index
    %c0_15 = arith.constant 0 : index
    %22 = vector.load %arg7[%c0_14, %c0_15] : memref<128x128xbf16, #tpu.memory_space<vmem>>, vector<128x128xbf16>
    %cst_16 = arith.constant dense<0.000000e+00> : vector<8x128xf32>
    %23 = tpu.matmul %8, %22, %cst_16 {dimension_numbers = #tpu.dot_dimension_numbers<[1], [0], [0], [1], [0, 0, 1, 1], [], []>} : vector<8x128xbf16>, vector<128x128xbf16>, vector<8x128xf32> -> vector<8x128xf32>
    %c0_17 = arith.constant 0 : index
    %c0_18 = arith.constant 0 : index
    %24 = vector.load %arg8[%c0_17, %c0_18] : memref<1x128xf32, #tpu.memory_space<vmem>>, vector<1x128xf32>
    %25 = vector.broadcast %24 : vector<1x128xf32> to vector<8x128xf32>
    %26 = arith.addf %23, %25 : vector<8x128xf32>
    %cst_19 = arith.constant 0.000000e+00 : f32
    %27 = vector.broadcast %cst_19 : f32 to vector<8x128xf32>
    %28 = arith.maximumf %26, %27 : vector<8x128xf32>
    %29 = arith.truncf %28 : vector<8x128xf32> to vector<8x128xbf16>
    %c0_20 = arith.constant 0 : index
    %c0_21 = arith.constant 0 : index
    %30 = vector.load %arg9[%c0_20, %c0_21] : memref<128x128xbf16, #tpu.memory_space<vmem>>, vector<128x128xbf16>
    %cst_22 = arith.constant dense<0.000000e+00> : vector<8x128xf32>
    %31 = tpu.matmul %29, %30, %cst_22 {dimension_numbers = #tpu.dot_dimension_numbers<[1], [0], [0], [1], [0, 0, 1, 1], [], []>} : vector<8x128xbf16>, vector<128x128xbf16>, vector<8x128xf32> -> vector<8x128xf32>
    %c0_23 = arith.constant 0 : index
    %c0_24 = arith.constant 0 : index
    %32 = vector.load %arg10[%c0_23, %c0_24] : memref<1x128xf32, #tpu.memory_space<vmem>>, vector<1x128xf32>
    %33 = vector.broadcast %32 : vector<1x128xf32> to vector<8x128xf32>
    %34 = arith.addf %31, %33 : vector<8x128xf32>
    %c0_25 = arith.constant 0 : index
    %c0_26 = arith.constant 0 : index
    %35 = vector.load %arg11[%c0_25, %c0_26] : memref<8x128xf32, #tpu.memory_space<vmem>>, vector<8x128xf32>
    tpu.vector_store %arg11[%c0_25, %c0_26], %34 {strides = array<i32>} : memref<8x128xf32, #tpu.memory_space<vmem>>, vector<8x128xf32>,
    %c0_27 = arith.constant 0 : index
    %c0_28 = arith.constant 0 : index
    %36 = vector.load %arg12[%c0_27, %c0_28] : memref<8x384xf32, #tpu.memory_space<vmem>>, vector<8x128xf32>
    tpu.vector_store %arg12[%c0_27, %c0_28], %14 {strides = array<i32>} : memref<8x384xf32, #tpu.memory_space<vmem>>, vector<8x128xf32>,
    %c0_29 = arith.constant 0 : index
    %c128 = arith.constant 128 : index
    %37 = vector.load %arg12[%c0_29, %c128] : memref<8x384xf32, #tpu.memory_space<vmem>>, vector<8x128xf32>
    tpu.vector_store %arg12[%c0_29, %c128], %15 {strides = array<i32>} : memref<8x384xf32, #tpu.memory_space<vmem>>, vector<8x128xf32>,
    %c0_30 = arith.constant 0 : index
    %c256 = arith.constant 256 : index
    %38 = vector.load %arg12[%c0_30, %c256] : memref<8x384xf32, #tpu.memory_space<vmem>>, vector<8x128xf32>
    tpu.vector_store %arg12[%c0_30, %c256], %21 {strides = array<i32>} : memref<8x384xf32, #tpu.memory_space<vmem>>, vector<8x128xf32>,
    return
  }
  func.func @transform_0(%arg0: i32) -> (i32, i32) {
    %c0_i32 = arith.constant 0 : i32
    %c0_i32_0 = arith.constant 0 : i32
    return %arg0, %c0_i32 : i32, i32
  }
  func.func @transform_1(%arg0: i32) -> (i32, i32) {
    %c0_i32 = arith.constant 0 : i32
    %c0_i32_0 = arith.constant 0 : i32
    return %arg0, %c0_i32 : i32, i32
  }
  func.func @transform_2(%arg0: i32) -> (i32, i32) {
    %c0_i32 = arith.constant 0 : i32
    %c0_i32_0 = arith.constant 0 : i32
    %c0_i32_1 = arith.constant 0 : i32
    return %c0_i32, %c0_i32_0 : i32, i32
  }
  func.func @transform_3(%arg0: i32) -> (i32, i32) {
    %c0_i32 = arith.constant 0 : i32
    %c0_i32_0 = arith.constant 0 : i32
    %c0_i32_1 = arith.constant 0 : i32
    return %c0_i32, %c0_i32_0 : i32, i32
  }
  func.func @transform_4(%arg0: i32) -> (i32, i32) {
    %c0_i32 = arith.constant 0 : i32
    %c0_i32_0 = arith.constant 0 : i32
    %c0_i32_1 = arith.constant 0 : i32
    return %c0_i32, %c0_i32_0 : i32, i32
  }
  func.func @transform_5(%arg0: i32) -> (i32, i32) {
    %c0_i32 = arith.constant 0 : i32
    %c0_i32_0 = arith.constant 0 : i32
    %c0_i32_1 = arith.constant 0 : i32
    return %c0_i32, %c0_i32_0 : i32, i32
  }
  func.func @transform_6(%arg0: i32) -> (i32, i32) {
    %c0_i32 = arith.constant 0 : i32
    %c0_i32_0 = arith.constant 0 : i32
    %c0_i32_1 = arith.constant 0 : i32
    return %c0_i32, %c0_i32_0 : i32, i32
  }
  func.func @transform_7(%arg0: i32) -> (i32, i32) {
    %c0_i32 = arith.constant 0 : i32
    %c0_i32_0 = arith.constant 0 : i32
    %c0_i32_1 = arith.constant 0 : i32
    return %c0_i32, %c0_i32_0 : i32, i32
  }
  func.func @transform_8(%arg0: i32) -> (i32, i32) {
    %c0_i32 = arith.constant 0 : i32
    %c0_i32_0 = arith.constant 0 : i32
    %c0_i32_1 = arith.constant 0 : i32
    return %c0_i32, %c0_i32_0 : i32, i32
  }
  func.func @transform_9(%arg0: i32) -> (i32, i32) {
    %c0_i32 = arith.constant 0 : i32
    %c0_i32_0 = arith.constant 0 : i32
    %c0_i32_1 = arith.constant 0 : i32
    return %c0_i32, %c0_i32_0 : i32, i32
  }
  func.func @transform_10(%arg0: i32) -> (i32, i32) {
    %c0_i32 = arith.constant 0 : i32
    %c0_i32_0 = arith.constant 0 : i32
    return %arg0, %c0_i32 : i32, i32
  }
  func.func @transform_11(%arg0: i32) -> (i32, i32) {
    %c0_i32 = arith.constant 0 : i32
    %c0_i32_0 = arith.constant 0 : i32
    return %arg0, %c0_i32 : i32, i32
  }
}

</mosaic_0001>

<bundles_post_ra>
// kernel: vae_forward.1
= control target key start
LH: loop header
LB: loop body
LE: loop exit
PB: predicated region body
PF: predicated region fallthrough
CT: control target
= control target key end

     0   :  { %17 = vsyncpa [#allocation3], 0  ;;  %s1042_s0 = inlined_call_operand.vmem [shape: bf16[8,128], index: 0, kind: input, shape index: {}]   ;;  %s1043_s1 = inlined_call_operand.vmem [shape: f32[8,128], index: 1, kind: input, shape index: {}]   ;;  %s1044_s2 = inlined_call_operand.vmem [shape: bf16[128,128], index: 2, kind: input, shape index: {}]   ;;  %s1045_s3 = inlined_call_operand.vmem [shape: f32[1,128], index: 3, kind: input, shape index: {}]   ;;  %s1046_s4 = inlined_call_operand.hbm [shape: bf16[128,256], index: 4, kind: input, shape index: {}]   ;;  %s1047_s5 = inlined_call_operand.vmem [shape: f32[1,256], index: 5, kind: input, shape index: {}]   ;;  %s1048_s6 = inlined_call_operand.hbm [shape: bf16[128,128], index: 6, kind: input, shape index: {}]   ;;  %s1049_s7 = inlined_call_operand.vmem [shape: f32[1,128], index: 7, kind: input, shape index: {}]   ;;  %s1050_s8 = inlined_call_operand.hbm [shape: bf16[128,128], index: 8, kind: input, shape index: {}]   ;;  %s1051_s9 = inlined_call_operand.vmem [shape: f32[1,128], index: 9, kind: input, shape index: {}]   ;;  %s1052_s10 = inlined_call_operand.vmem [shape: f32[8,128], index: 10, kind: output, shape index: {0}]   ;;  %s1053_s11 = inlined_call_operand.vmem [shape: f32[8,384], index: 11, kind: output, shape index: {1}]  }
   0x1   :  { %18 = vsyncpa [#allocation5], 0  ;;  %s846_s17 = smov [#allocation4]   ;;  %s776_s21 = scalar_lea.hbm %s1048_s6, 1024 }
   0x2   :  { %s46_s18 = sshll.u32 %s846_s17, 4  ;;  %p777_p0 = scmp.ne.s32.totalorder %s1048_s6, %s776_s21  ;;  %s47_s18 = int_to_ptr.vmem [resolvable:$true] %s46_s18 }
   0x3   :  { %p780_p1 = scmp.lt.u32.totalorder %s776_s21, %s1048_s6 }
   0x5   :  { %p782_p2 = pnand %p780_p1, %p777_p0 }
   0x7   :  { %785 = shalt.err (!%p782_p2)
}
   0x8   :  { %s786_s26 = scalar_lea.vmem %s47_s18, 1024  ;;  %p791_p4 = scmp.lt.s32.totalorder %s47_s18, %s47_s18 }
   0x9   :  { %p787_p3 = scmp.ne.s32.totalorder %s47_s18, %s786_s26  ;;  %p792_p5 = scmp.lt.s32.totalorder %s786_s26, %s786_s26 }
   0xb   :  { %p793_p6 = por %p792_p5, %p791_p4 }
   0xd   :  { %p794_p7 = pnand %p793_p6, %p787_p3 }
   0xf   :  { %797 = shalt.err (!%p794_p7)
}
  0x10   :  { %s847_s27 = smov 64   ;;  %s848_s28 = smov 4  }
  0x11   :  { %52 = dma.hbm_to_vmem [thread:$0]  %s1048_s6, 1024, %s47_s18, [#allocation5], %s847_s27, %s847_s27, %s848_s28  }
  0x12   :  { %s849_s12 = smov [#allocation2]   ;;  %s798_s16 = scalar_lea.hbm %s1046_s4, 2048 }
  0x13   :  { %s32_s13 = sshll.u32 %s849_s12, 4  ;;  %p799_p8 = scmp.ne.s32.totalorder %s1046_s4, %s798_s16  ;;  %s33_s13 = int_to_ptr.vmem [resolvable:$true] %s32_s13 }
  0x14   :  { %p802_p9 = scmp.lt.u32.totalorder %s798_s16, %s1046_s4 }
  0x16   :  { %p804_p10 = pnand %p802_p9, %p799_p8 }
  0x18   :  { %807 = shalt.err (!%p804_p10)
}
  0x19   :  { %s808_s22 = scalar_lea.vmem %s33_s13, 2048  ;;  %p813_p12 = scmp.lt.s32.totalorder %s33_s13, %s33_s13 }
  0x1a   :  { %p809_p11 = scmp.ne.s32.totalorder %s33_s13, %s808_s22  ;;  %p814_p13 = scmp.lt.s32.totalorder %s808_s22, %s808_s22 }
  0x1c   :  { %p815_p0 = por %p814_p13, %p813_p12 }
  0x1e   :  { %p816_p1 = pnand %p815_p0, %p809_p11 }
  0x20   :  { %819 = shalt.err (!%p816_p1)
}
  0x21   :  { %s850_s6 = smov 128   ;;  %s851_s18 = smov 8  }
  0x22   :  { %38 = dma.hbm_to_vmem [thread:$0]  %s1046_s4, 2048, %s33_s13, [#allocation3], %s850_s6, %s850_s6, %s851_s18  }
  0x23   :  { %s852_s25 = smov [#allocation6]   ;;  %s820_s12 = scalar_lea.hbm %s1050_s8, 1024 }
  0x24   :  { %s60_s26 = sshll.u32 %s852_s25, 4  ;;  %p821_p2 = scmp.ne.s32.totalorder %s1050_s8, %s820_s12  ;;  %s61_s26 = int_to_ptr.vmem [resolvable:$true] %s60_s26 }
  0x25   :  { %p824_p3 = scmp.lt.u32.totalorder %s820_s12, %s1050_s8 }
  0x27   :  { %p826_p4 = pnand %p824_p3, %p821_p2 }
  0x29   :  { %829 = shalt.err (!%p826_p4)
}
  0x2a   :  { %s830_s19 = scalar_lea.vmem %s61_s26, 1024  ;;  %p835_p6 = scmp.lt.s32.totalorder %s61_s26, %s61_s26 }
  0x2b   :  { %p831_p5 = scmp.ne.s32.totalorder %s61_s26, %s830_s19  ;;  %p836_p7 = scmp.lt.s32.totalorder %s830_s19, %s830_s19 }
  0x2d   :  { %p837_p8 = por %p836_p7, %p835_p6 }
  0x2f   :  { %p838_p9 = pnand %p837_p8, %p831_p5 }
  0x31   :  { %841 = shalt.err (!%p838_p9)
}
  0x32   :  { %66 = dma.hbm_to_vmem [thread:$0]  %s1050_s8, 1024, %s61_s26, [#allocation5], %s847_s27, %s847_s27, %s848_s28  }
  0x33   :  { %842 = dma.done.wait [#allocation3], 2048  }
  0x34   :  { %843 = vsyncadd [#allocation3], 4294965248 }
  0x35   :  { %844 = dma.done.wait [#allocation5], 2048  }
  0x36   :  { %845 = vsyncadd [#allocation5], 4294965248  ;;  %v853_v0 = vmov 0.0   ;;  %vm854_vm0 = vmmov 0   ;;  %v726_v1 = vld [vmem:[%s1044_s2] sm:$0xff]   ;;  %v727_v2 = vld [vmem:[%s1044_s2 + $0x8] sm:$0xff]   ;;  %v211_v51 = vlaneseq }
  0x37   :  { %656 = vmatprep.subr.bf16.mxu0 %v853_v0  ;;  %672 = vmatprep.mubr.msk.bf16.mxu0 %vm854_vm0, %v853_v0  ;;  %v728_v3 = vld [vmem:[%s1044_s2 + $0x10] sm:$0xff]   ;;  %v734_v4 = vld [vmem:[#allocation2 + $0x4] ss:$8 sps:$4 sm:$0xff]   ;;  %v736_v5 = vld [vmem:[#allocation2] ss:$8 sps:$4 sm:$0xff]   ;;  %v855_v34 = vmov 0  }
  0x38   :  { %657 = vmatpush3.bf16.msra.mxu0 %v726_v1  ;;  %v729_v6 = vld [vmem:[%s1044_s2 + $0x18] sm:$0xff]   ;;  %301 = vmatprep.subr.bf16.mxu1 %v734_v4  ;;  %v742_v9 = vld [vmem:[#allocation2 + $0x24] ss:$8 sps:$4 sm:$0xff]   ;;  %v744_v11 = vld [vmem:[#allocation2 + $0x20] ss:$8 sps:$4 sm:$0xff]   ;;  %v212_v52 = vshrl.u32 %v211_v51, 7 }
  0x39   :  { %658 = vmatprep.subr.bf16.mxu0 %v853_v0  ;;  %v738_v7 = vld [vmem:[#allocation2 + $0x14] ss:$8 sps:$4 sm:$0xff]   ;;  %302 = vmatpush1.bf16.msra.mxu1 %v736_v5  ;;  %v740_v8 = vld [vmem:[#allocation2 + $0x10] ss:$8 sps:$4 sm:$0xff]   ;;  %v730_v10 = vld [vmem:[%s1044_s2 + $0x20] sm:$0xff]  }
  0x3a   :  { %303 = vmatprep.subr.bf16.mxu1 %v738_v7  ;;  %v746_v12 = vld [vmem:[#allocation2 + $0x34] ss:$8 sps:$4 sm:$0xff]   ;;  %v731_v13 = vld [vmem:[%s1044_s2 + $0x28] sm:$0xff]   ;;  %v748_v14 = vld [vmem:[#allocation2 + $0x30] ss:$8 sps:$4 sm:$0xff]   ;;  %333 = vmatprep.mubr.bf16.mxu1 %v855_v34  ;;  %v213_v53 = vsub.s32 0, %v212_v52 }
  0x3b   :  { %v750_v15 = vld [vmem:[#allocation2 + $0x44] ss:$8 sps:$4 sm:$0xff]   ;;  %v732_v16 = vld [vmem:[%s1044_s2 + $0x30] sm:$0xff]   ;;  %v752_v17 = vld [vmem:[#allocation2 + $0x40] ss:$8 sps:$4 sm:$0xff]   ;;  %v217_v55 = vsub.s32 1, %v212_v52 }
  0x3c   :  { %659 = vmatpush3.bf16.msra.mxu0 %v727_v2  ;;  %v754_v18 = vld [vmem:[#allocation2 + $0x54] ss:$8 sps:$4 sm:$0xff]   ;;  %v756_v20 = vld [vmem:[#allocation2 + $0x50] ss:$8 sps:$4 sm:$0xff]   ;;  %v758_v21 = vld [vmem:[#allocation2 + $0x64] ss:$8 sps:$4 sm:$0xff]  }
  0x3d   :  { %660 = vmatprep.subr.bf16.mxu0 %v853_v0  ;;  %304 = vmatpush1.bf16.msra.mxu1 %v740_v8  ;;  %v733_v19 = vld [vmem:[%s1044_s2 + $0x38] sm:$0xff]   ;;  %v79_v22 = vld [vmem:[%s1042_s0] sm:$0xf]  ;;  %v741_v24 = vld [vmem:[#allocation4 + $0x8] sm:$0xff]  }
  0x3e   :  { %305 = vmatprep.subr.bf16.mxu1 %v742_v9  ;;  %v737_v23 = vld [vmem:[#allocation4] sm:$0xff]   ;;  %v745_v25 = vld [vmem:[#allocation4 + $0x10] sm:$0xff]   ;;  %v749_v26 = vld [vmem:[#allocation4 + $0x18] sm:$0xff]  }
  0x3f   :  { %v753_v27 = vld [vmem:[#allocation4 + $0x20] sm:$0xff]   ;;  %v757_v28 = vld [vmem:[#allocation4 + $0x28] sm:$0xff]   ;;  %v761_v30 = vld [vmem:[#allocation4 + $0x30] sm:$0xff]  }
  0x40   :  { %661 = vmatpush3.bf16.msra.mxu0 %v728_v3  ;;  %v760_v29 = vld [vmem:[#allocation2 + $0x60] ss:$8 sps:$4 sm:$0xff]   ;;  %v762_v31 = vld [vmem:[#allocation2 + $0x74] ss:$8 sps:$4 sm:$0xff]   ;;  %v764_v32 = vld [vmem:[#allocation2 + $0x70] ss:$8 sps:$4 sm:$0xff]  }
  0x41   :  { %662 = vmatprep.subr.bf16.mxu0 %v853_v0  ;;  %306 = vmatpush1.bf16.msra.mxu1 %v744_v11  ;;  %v765_v33 = vld [vmem:[#allocation4 + $0x38] sm:$0xff]   ;;  %v586_v35 = vld [vmem:[%s1045_s3] ss:$0 sm:$0xff]  ;;  %v767_v44 = vld [vmem:[#allocation6 + $0x8] sm:$0xff]  }
  0x42   :  { %307 = vmatprep.subr.bf16.mxu1 %v746_v12  ;;  %v766_v42 = vld [vmem:[#allocation6] sm:$0xff]   ;;  %v768_v45 = vld [vmem:[#allocation6 + $0x10] sm:$0xff]   ;;  %v769_v46 = vld [vmem:[#allocation6 + $0x18] sm:$0xff]  }
  0x43   :  { %v770_v47 = vld [vmem:[#allocation6 + $0x20] sm:$0xff]   ;;  %v771_v48 = vld [vmem:[#allocation6 + $0x28] sm:$0xff]   ;;  %v772_v49 = vld [vmem:[#allocation6 + $0x30] sm:$0xff]  }
  0x44   :  { %663 = vmatpush3.bf16.msra.mxu0 %v729_v6  ;;  %v773_v50 = vld [vmem:[#allocation6 + $0x38] sm:$0xff]   ;;  %v209_v54 = vld [vmem:[%s1047_s5] sm:$0x3] }
  0x45   :  { %664 = vmatprep.subr.bf16.mxu0 %v853_v0  ;;  %308 = vmatpush1.bf16.msra.mxu1 %v748_v14  ;;  %v214_v56 = vrot.slane %v209_v54, %v213_v53  ;;  %v611_v57 = vld [vmem:[%s1049_s7] ss:$0 sm:$0xff]  ;;  %v218_v58 = vrot.slane %v209_v54, %v217_v55 }
  0x46   :  { %309 = vmatprep.subr.bf16.mxu1 %v750_v15  ;;  %v620_v14 = vld [vmem:[%s1051_s9] ss:$0 sm:$0xff] }
  0x48   :  { %665 = vmatpush3.bf16.msra.mxu0 %v730_v10  ;;  %v345_v10 = vld [vmem:[%s1043_s1] sm:$0xff] }
  0x49   :  { %666 = vmatprep.subr.bf16.mxu0 %v853_v0  ;;  %310 = vmatpush1.bf16.msra.mxu1 %v752_v17 }
  0x4a   :  { %311 = vmatprep.subr.bf16.mxu1 %v754_v18 }
  0x4c   :  { %667 = vmatpush3.bf16.msra.mxu0 %v731_v13 }
  0x4d   :  { %668 = vmatprep.subr.bf16.mxu0 %v853_v0  ;;  %312 = vmatpush1.bf16.msra.mxu1 %v756_v20 }
  0x4e   :  { %313 = vmatprep.subr.bf16.mxu1 %v758_v21 }
  0x50   :  { %669 = vmatpush3.bf16.msra.mxu0 %v732_v16 }
  0x51   :  { %670 = vmatprep.subr.bf16.mxu0 %v853_v0  ;;  %314 = vmatpush1.bf16.msra.mxu1 %v760_v29 }
  0x52   :  { %315 = vmatprep.subr.bf16.mxu1 %v762_v31 }
  0x54   :  { %671 = vmatpush3.bf16.msra.mxu0 %v733_v19 }
  0x55   :  { %676 = vmatprep.subr.bf16.mxu0 %v853_v0  ;;  %316 = vmatpush1.bf16.msra.mxu1 %v764_v32 }
  0x56   :  { %696 = vmatprep.subr.bf16.mxu1 %v853_v0 }
  0x57   :  { %673 = vmatmul.mubr.bf16.vlgmr.msra.gmra.mrb[0].mxu0 %v79_v22 }
  0x58   :  { %677 = vmatpush3.bf16.msra.mxu0 %v737_v23  ;;  %692 = vmatprep.mubr.msk.bf16.mxu0 %vm854_vm0, %v853_v0 }
  0x59   :  { %678 = vmatprep.subr.bf16.mxu0 %v853_v0 }
  0x5c   :  { %679 = vmatpush3.bf16.msra.mxu0 %v741_v24 }
  0x5d   :  { %680 = vmatprep.subr.bf16.mxu0 %v853_v0 }
  0x60   :  { %681 = vmatpush3.bf16.msra.mxu0 %v745_v25 }
  0x61   :  { %682 = vmatprep.subr.bf16.mxu0 %v853_v0 }
  0x64   :  { %683 = vmatpush3.bf16.msra.mxu0 %v749_v26 }
  0x65   :  { %684 = vmatprep.subr.bf16.mxu0 %v853_v0 }
  0x68   :  { %685 = vmatpush3.bf16.msra.mxu0 %v753_v27 }
  0x69   :  { %686 = vmatprep.subr.bf16.mxu0 %v853_v0 }
  0x6c   :  { %687 = vmatpush3.bf16.msra.mxu0 %v757_v28 }
  0x6d   :  { %688 = vmatprep.subr.bf16.mxu0 %v853_v0 }
  0x70   :  { %689 = vmatpush3.bf16.msra.mxu0 %v761_v30 }
  0x71   :  { %690 = vmatprep.subr.bf16.mxu0 %v853_v0 }
  0x74   :  { %691 = vmatpush3.bf16.msra.mxu0 %v765_v33 }
 0x12a   :  { %v185_v36 = vpop.f32.mrb[0].mxu0 }
 0x12b   :  { %v186_v37 = vadd.f32 %v586_v35, %v185_v36  ;;  %v674_v38 = vpop.f32.mrb[1].mxu0 }
 0x12c   :  { %v188_v39 = vpop.f32.mrb[2].mxu0 }
 0x12d   :  { %v191_v40 = vmax.f32 %v186_v37, 0.0  ;;  %v675_v41 = vpop.f32.mrb[3].mxu0 }
 0x12f   :  { %v192_v43 = vpack.c.bf16 %v191_v40, %v191_v40 }
 0x131   :  { %334 = vmatmul.mubr.bf16.vlgmr.msra.gmra.mrb[0].mxu1 %v192_v43  ;;  %693 = vmatmul.mubr.bf16.vlgmr.msra.gmra.mrb[4].mxu0 %v192_v43 }
 0x132   :  { %697 = vmatpush3.bf16.msra.mxu1 %v766_v42  ;;  %712 = vmatprep.mubr.msk.bf16.mxu1 %vm854_vm0, %v853_v0 }
 0x133   :  { %698 = vmatprep.subr.bf16.mxu1 %v853_v0 }
 0x136   :  { %699 = vmatpush3.bf16.msra.mxu1 %v767_v44 }
 0x137   :  { %700 = vmatprep.subr.bf16.mxu1 %v853_v0 }
 0x13a   :  { %701 = vmatpush3.bf16.msra.mxu1 %v768_v45 }
 0x13b   :  { %702 = vmatprep.subr.bf16.mxu1 %v853_v0 }
 0x13e   :  { %703 = vmatpush3.bf16.msra.mxu1 %v769_v46 }
 0x13f   :  { %704 = vmatprep.subr.bf16.mxu1 %v853_v0 }
 0x142   :  { %705 = vmatpush3.bf16.msra.mxu1 %v770_v47 }
 0x143   :  { %706 = vmatprep.subr.bf16.mxu1 %v853_v0 }
 0x146   :  { %707 = vmatpush3.bf16.msra.mxu1 %v771_v48 }
 0x147   :  { %708 = vmatprep.subr.bf16.mxu1 %v853_v0 }
 0x14a   :  { %709 = vmatpush3.bf16.msra.mxu1 %v772_v49 }
 0x14b   :  { %710 = vmatprep.subr.bf16.mxu1 %v853_v0 }
 0x14e   :  { %711 = vmatpush3.bf16.msra.mxu1 %v773_v50 }
 0x204   :  { %v335_v59 = vpop.f32.mrb[0].mxu1  ;;  %v453_v60 = vpop.f32.mrb[4].mxu0 }
 0x205   :  { %v336_v61 = vadd.f32 %v335_v59, %v214_v56  ;;  %v454_v62 = vadd.f32 %v611_v57, %v453_v60  ;;  %v337_v63 = vpop.f32.mrb[1].mxu1  ;;  %v694_v0 = vpop.f32.mrb[5].mxu0 }
 0x206   :  { %v338_v1 = vadd.f32 %v337_v63, %v218_v58  ;;  %v339_v2 = vpop.f32.mrb[2].mxu1  ;;  %v456_v3 = vpop.f32.mrb[6].mxu0 }
 0x207   :  { %573 = vst [vmem:[%s1053_s11] sm:$0xff] %v336_v61  ;;  %v459_v4 = vmax.f32 %v454_v62, 0.0  ;;  %v340_v5 = vpop.f32.mrb[3].mxu1  ;;  %v695_v6 = vpop.f32.mrb[7].mxu0 }
 0x208   :  { %v342_v7 = vmul.f32 0.5, %v338_v1  ;;  %574 = vst [vmem:[%s1053_s11 + $0x8] sm:$0xff] %v338_v1 }
 0x209   :  { %v460_v8 = vpack.c.bf16 %v459_v4, %v459_v4 }
 0x20a   :  { %v343_v9 = vmul.f32 1.442695, %v342_v7 }
 0x20b   :  { %713 = vmatmul.mubr.bf16.vlgmr.msra.gmra.mrb[4].mxu1 %v460_v8 }
 0x20c   :  { %774 = vpow2.f32 %v343_v9 }
 0x216   :  { %v775_v11 = vpop.eup %774 }
 0x217   :  { %v346_v12 = vmul.f32 %v775_v11, %v345_v10 }
 0x219   :  { %v347_v13 = vadd.f32 %v346_v12, %v336_v61 }
 0x21b   :  { %575 = vst [vmem:[%s1053_s11 + $0x10] sm:$0xff] %v347_v13 }
 0x2de   :  { %v566_v15 = vpop.f32.mrb[4].mxu1 }
 0x2df   :  { %v567_v16 = vadd.f32 %v620_v14, %v566_v15  ;;  %v714_v17 = vpop.f32.mrb[5].mxu1 }
 0x2e0   :  { %v569_v18 = vpop.f32.mrb[6].mxu1 }
 0x2e1   :  { %572 = vst [vmem:[%s1052_s10] sm:$0xff] %v567_v16  ;;  %v715_v19 = vpop.f32.mrb[7].mxu1 }
 0x2e2   :  { %584 = vsyncpa [#allocation3], 1 }
 0x2e3   :  { %585 = vsyncpa [#allocation5], 1 }

</bundles_post_ra>
